<compile_context>
chip_gen: v7x
topology: tpu7x:2x2x1
jax: 0.10.0
libtpu: 0.0.40
codegen_flags: <defaults>
</compile_context>

<pallas_src>
import math
import functools

import jax
import jax.numpy as jnp
from jax import lax
from jax.experimental import pallas as pl
from jax.experimental.pallas import tpu as pltpu


def make_pe_table(d_model: int, max_len: int = 5000) -> jnp.ndarray:
    """Deterministic sinusoidal positional-encoding table, shape (max_len, d_model)."""
    pos = jnp.arange(max_len, dtype=jnp.float32)[:, None]                       # (max_len, 1)
    div = jnp.exp(jnp.arange(0, d_model, 2, dtype=jnp.float32)
                  * (-math.log(10000.0) / d_model))                             # (d_model/2,)
    pe = jnp.zeros((max_len, d_model), dtype=jnp.float32)
    pe = pe.at[:, 0::2].set(jnp.sin(pos * div))
    pe = pe.at[:, 1::2].set(jnp.cos(pos * div))
    return pe


def _hash_u32(x):
    """splitmix32-style finalizer: cheap, counter-based, pure VPU integer ops."""
    x = x ^ (x >> jnp.uint32(16))
    x = x * jnp.uint32(0x7FEB352D)
    x = x ^ (x >> jnp.uint32(15))
    x = x * jnp.uint32(0x846CA68B)
    x = x ^ (x >> jnp.uint32(16))
    return x


def _pe_dropout_kernel(seed_ref, x_ref, pe_ref, o_ref, *, p: float, training: bool,
                       s_tile: int):
    # x_ref: (S_TILE, B, D) block, pe_ref: (S_TILE, D) block (broadcast over batch).
    x = x_ref[...].astype(jnp.float32)
    pe = pe_ref[...].astype(jnp.float32)
    y = x + pe[:, None, :]                      # single broadcast per kernel body

    if training and p > 0.0:
        st, b, d = x_ref.shape
        # Global element index -> counter-based hash -> integer-domain keep decision.
        row0 = pl.program_id(0) * s_tile
        s_idx = lax.broadcasted_iota(jnp.int32, (st, b, d), 0) + row0
        b_idx = lax.broadcasted_iota(jnp.int32, (st, b, d), 1)
        d_idx = lax.broadcasted_iota(jnp.int32, (st, b, d), 2)
        flat = (s_idx * b + b_idx) * d + d_idx
        ctr = flat.astype(jnp.uint32) + seed_ref[0].astype(jnp.uint32) * jnp.uint32(0x9E3779B9)
        bits = _hash_u32(ctr)
        thresh = jnp.uint32(min(int(p * 4294967296.0), 4294967295))
        keep = bits >= thresh                   # P(keep) = 1 - p
        scale = jnp.float32(1.0 / (1.0 - p))
        y = jnp.where(keep, y * scale, jnp.float32(0.0))   # scale folded into the select

    o_ref[...] = y.astype(o_ref.dtype)


def positional_encoding2(x, pe_table, seed, *, p: float = 0.1, training: bool = True,
                         target_block_bytes: int = 2 << 20):
    """x: (S, B, D); pe_table: (max_len, D) f32; seed: int32[1] (nonnegative)."""
    S, B, D = x.shape
    max_len, d_pe = pe_table.shape
    assert d_pe == D and S <= max_len

    # Tile over the sequence axis: ~2 MiB blocks (safe for v7x's 64 MiB VMEM with
    # double-buffered x + out), rows a multiple of 8 so the (S_TILE, D) PE block is legal.
    bytes_per_row = B * D * jnp.dtype(x.dtype).itemsize
    s_tile = (target_block_bytes // max(bytes_per_row, 1)) // 8 * 8
    s_tile = max(8, min(s_tile, ((S + 7) // 8) * 8))
    grid = (pl.cdiv(S, s_tile),)

    kernel = functools.partial(_pe_dropout_kernel, p=float(p), training=bool(training),
                               s_tile=s_tile)

    return pl.pallas_call(
        kernel,
        out_shape=jax.ShapeDtypeStruct((S, B, D), x.dtype),
        grid_spec=pltpu.PrefetchScalarGridSpec(
            num_scalar_prefetch=1,          # seed lands in SMEM
            grid=grid,
            in_specs=[
                pl.BlockSpec((s_tile, B, D), lambda i, seed_ref: (i, 0, 0)),
                pl.BlockSpec((s_tile, D), lambda i, seed_ref: (i, 0)),   # slice PE per tile
            ],
            out_specs=pl.BlockSpec((s_tile, B, D), lambda i, seed_ref: (i, 0, 0)),
        ),
        compiler_params=pltpu.CompilerParams(
            dimension_semantics=("parallel",)),   # shard seq-tiles across TCs (v7x)
    )(seed, x, pe_table)


if __name__ == "__main__":
    # Small shapes consistent with the module: seq=8, batch=2, d_model=32.
    S, B, D = 8, 2, 32
    max_len = 5000
    dropout_p = 0.1

    key = jax.random.PRNGKey(0)
    x = jax.random.normal(key, (S, B, D), dtype=jnp.float32)

    pe_table = make_pe_table(D, max_len)
    seed = jnp.array([1234], dtype=jnp.int32)

    ref = x + pe_table[:S][:, None, :]

    # Eval-mode forward (dropout is identity) -> exact check vs pure-JAX reference.
    out_eval = jax.block_until_ready(
        positional_encoding2(x, pe_table, seed, p=dropout_p, training=False))
    assert out_eval.shape == (S, B, D) and out_eval.dtype == x.dtype
    assert jnp.allclose(out_eval, ref, atol=1e-5), "eval-mode mismatch vs reference"

    # Training-mode forward: every element must be either dropped (0) or scaled by 1/(1-p).
    out_train = jax.block_until_ready(
        positional_encoding2(x, pe_table, seed, p=dropout_p, training=True))
    scale = 1.0 / (1.0 - dropout_p)
    is_zero = out_train == 0.0
    is_scaled = jnp.isclose(out_train, ref * scale, atol=1e-5)
    assert bool(jnp.all(is_zero | is_scaled)), "train-mode values not in {0, scaled(x+pe)}"
    drop_frac = float(jnp.mean(is_zero.astype(jnp.float32)))
    assert 0.0 <= drop_frac < 0.5, f"implausible drop fraction {drop_frac}"

    print("KERNEL_OK")
</pallas_src>

<mosaic_0001>
module attributes {stable_mosaic.version = 11 : i64} {
  func.func @_pe_dropout_kernel(%arg0: i32, %arg1: memref<1xi32, #tpu.memory_space<smem>>, %arg2: memref<8x2x32xf32, #tpu.memory_space<vmem>>, %arg3: memref<8x32xf32, #tpu.memory_space<vmem>>, %arg4: memref<8x2x32xf32, #tpu.memory_space<vmem>>) attributes {dimension_semantics = [#tpu.dimension_semantics<parallel>], iteration_bounds = array<i64: 1>, scalar_prefetch = 1 : i64, scratch_operands = 0 : i64, tpu.core_type = #tpu.core_type<tc>, window_params = [{transform_indices = @transform_0, window_bounds = array<i64: 8, 2, 32>}, {transform_indices = @transform_1, window_bounds = array<i64: 8, 32>}, {transform_indices = @transform_2, window_bounds = array<i64: 8, 2, 32>}]} {
    %c0 = arith.constant 0 : index
    %c0_0 = arith.constant 0 : index
    %c0_1 = arith.constant 0 : index
    %0 = vector.load %arg2[%c0, %c0_0, %c0_1] : memref<8x2x32xf32, #tpu.memory_space<vmem>>, vector<8x2x32xf32>
    %c0_2 = arith.constant 0 : index
    %c0_3 = arith.constant 0 : index
    %1 = vector.load %arg3[%c0_2, %c0_3] : memref<8x32xf32, #tpu.memory_space<vmem>>, vector<8x32xf32>
    %2 = vector.shape_cast %1 : vector<8x32xf32> to vector<8x1x32xf32>
    %3 = vector.broadcast %2 : vector<8x1x32xf32> to vector<8x2x32xf32>
    %4 = arith.addf %0, %3 : vector<8x2x32xf32>
    %c0_4 = arith.constant 0 : index
    %c0_5 = arith.constant 0 : index
    %c0_6 = arith.constant 0 : index
    %5 = vector.load %arg4[%c0_4, %c0_5, %c0_6] : memref<8x2x32xf32, #tpu.memory_space<vmem>>, vector<8x2x32xf32>
    tpu.vector_store %arg4[%c0_4, %c0_5, %c0_6], %4 {strides = array<i32>} : memref<8x2x32xf32, #tpu.memory_space<vmem>>, vector<8x2x32xf32>,
    return
  }
  func.func @transform_0(%arg0: i32, %arg1: memref<1xi32, #tpu.memory_space<smem>>) -> (i32, i32, i32) {
    %c0_i32 = arith.constant 0 : i32
    %c0_i32_0 = arith.constant 0 : i32
    %c0_i32_1 = arith.constant 0 : i32
    return %arg0, %c0_i32, %c0_i32_0 : i32, i32, i32
  }
  func.func @transform_1(%arg0: i32, %arg1: memref<1xi32, #tpu.memory_space<smem>>) -> (i32, i32) {
    %c0_i32 = arith.constant 0 : i32
    %c0_i32_0 = arith.constant 0 : i32
    return %arg0, %c0_i32 : i32, i32
  }
  func.func @transform_2(%arg0: i32, %arg1: memref<1xi32, #tpu.memory_space<smem>>) -> (i32, i32, i32) {
    %c0_i32 = arith.constant 0 : i32
    %c0_i32_0 = arith.constant 0 : i32
    %c0_i32_1 = arith.constant 0 : i32
    return %arg0, %c0_i32, %c0_i32_0 : i32, i32, i32
  }
}

</mosaic_0001>

<bundles_post_ra>
// kernel: tpu_custom_call.1
= control target key start
LH: loop header
LB: loop body
LE: loop exit
PB: predicated region body
PF: predicated region fallthrough
CT: control target
= control target key end

     0   :  { %v28_v1 = vlaneseq  ;;  %v174_v2 = vmov 1966171168   ;;  %s245_s0 = inlined_call_operand.<no memory space> [shape: s32[1], index: 0, kind: input, shape index: {}]   ;;  %s246_s1 = inlined_call_operand.vmem [shape: f32[8,2,32], index: 1, kind: input, shape index: {}]   ;;  %s247_s2 = inlined_call_operand.vmem [shape: f32[5000,32], index: 2, kind: input, shape index: {}]   ;;  %s248_s3 = inlined_call_operand.hbm [shape: f32[8,2,32], index: 3, kind: output, shape index: {}]  }
   0x1   :  { %v22_v0 = vld [vmem:[%s247_s2] sm:$0xff]  ;;  %v26_v3 = vunpack.c.l.s4 %v174_v2 }
   0x2   :  { %v29_v4 = vshrl.u32 %v28_v1, 7  ;;  %v24_v6 = vcombine.high %v22_v0, %v22_v0 }
   0x3   :  { %v27_v5 = vunpack.c.0.s8 %v26_v3 }
   0x4   :  { %9 = vsyncpa [#allocation5], 0  ;;  %v75_v9 = vsub.s32 0, %v29_v4  ;;  %v14_v15 = vld [vmem:[%s246_s1] sm:$0x3]  ;;  %vm121_vm0 = vcmask 254976  }
   0x5   :  { %v30_v7 = vsub.s32 %v27_v5, %v29_v4  ;;  %v18_v19 = vld [vmem:[%s246_s1 + $0x8] sm:$0x3]  ;;  %v15_v21 = vld [vmem:[%s246_s1 + $0x2] sm:$0x3]  ;;  %v16_v22 = vld [vmem:[%s246_s1 + $0x4] sm:$0x3] }
   0x6   :  { %v19_v29 = vld [vmem:[%s246_s1 + $0xa] sm:$0x3]  ;;  %v20_v30 = vld [vmem:[%s246_s1 + $0xc] sm:$0x3]  ;;  %v17_v31 = vld [vmem:[%s246_s1 + $0x6] sm:$0x3] }
   0x7   :  { %v31_v8 = vrot.slane %v22_v0, %v30_v7  ;;  %v38_v10 = vrot.slane %v24_v6, %v30_v7  ;;  %v21_v39 = vld [vmem:[%s246_s1 + $0xe] sm:$0x3]  ;;  %s175_s28 = smov [#allocation4]  }
   0x8   :  { %s135_s29 = sshll.u32 %s175_s28, 4  ;;  %s136_s29 = int_to_ptr.vmem [resolvable:$true] %s135_s29 }
   0x9   :  { %v47_v11 = vrot.slane %v31_v8, %v30_v7  ;;  %v39_v12 = vcombine.high %v31_v8, %v31_v8  ;;  %v54_v13 = vrot.slane %v38_v10, %v30_v7  ;;  %v40_v14 = vcombine.high %v38_v10, %v38_v10  ;;  %s150_s1 = scalar_lea.vmem %s136_s29, 256  ;;  %p155_p1 = scmp.lt.s32.totalorder %s136_s29, %s136_s29 }
   0xa   :  { %p151_p0 = scmp.ne.s32.totalorder %s136_s29, %s150_s1  ;;  %p156_p2 = scmp.lt.s32.totalorder %s150_s1, %s150_s1 }
   0xb   :  { %v76_v16 = vrot.slane %v47_v11, %v75_v9  ;;  %v61_v17 = vrot.slane %v39_v12, %v30_v7  ;;  %v69_v18 = vcombine.high %v47_v11, %v47_v11  ;;  %v92_v20 = vrot.slane %v54_v13, %v75_v9 }
   0xc   :  { %v68_v23 = vrot.slane %v40_v14, %v30_v7  ;;  %v70_v24 = vcombine.high %v54_v13, %v54_v13  ;;  %p157_p3 = por %p156_p2, %p155_p1 }
   0xd   :  { %v113_v25 = vadd.f32 %v76_v16, %v14_v15  ;;  %v80_v26 = vrot.slane %v61_v17, %v75_v9  ;;  %v84_v27 = vrot.slane %v69_v18, %v75_v9  ;;  %v71_v28 = vcombine.high %v61_v17, %v61_v17 }
   0xe   :  { %v117_v32 = vadd.f32 %v92_v20, %v18_v19  ;;  %v96_v33 = vrot.slane %v68_v23, %v75_v9  ;;  %v100_v34 = vrot.slane %v70_v24, %v75_v9  ;;  %v72_v35 = vcombine.high %v68_v23, %v68_v23  ;;  %p158_p4 = pnand %p157_p3, %p151_p0 }
   0xf   :  { %122 = vst.msk [vmem:[#allocation4] sm:$0x3] %vm121_vm0, %v113_v25  ;;  %v114_v36 = vadd.f32 %v80_v26, %v15_v21  ;;  %v115_v37 = vadd.f32 %v84_v27, %v16_v22  ;;  %v88_v38 = vrot.slane %v71_v28, %v75_v9 }
  0x10   :  { %126 = vst.msk [vmem:[#allocation4 + $0x8] sm:$0x3] %vm121_vm0, %v117_v32  ;;  %v118_v40 = vadd.f32 %v96_v33, %v19_v29  ;;  %v119_v41 = vadd.f32 %v100_v34, %v20_v30  ;;  %v104_v42 = vrot.slane %v72_v35, %v75_v9 }
  0x11   :  { %123 = vst.msk [vmem:[#allocation4 + $0x2] sm:$0x3] %vm121_vm0, %v114_v36  ;;  %124 = vst.msk [vmem:[#allocation4 + $0x4] sm:$0x3] %vm121_vm0, %v115_v37  ;;  %v116_v43 = vadd.f32 %v88_v38, %v17_v31 }
  0x12   :  { %127 = vst.msk [vmem:[#allocation4 + $0xa] sm:$0x3] %vm121_vm0, %v118_v40  ;;  %128 = vst.msk [vmem:[#allocation4 + $0xc] sm:$0x3] %vm121_vm0, %v119_v41  ;;  %v120_v44 = vadd.f32 %v104_v42, %v21_v39 }
  0x13   :  { %125 = vst.msk [vmem:[#allocation4 + $0x6] sm:$0x3] %vm121_vm0, %v116_v43 }
  0x14   :  { %129 = vst.msk [vmem:[#allocation4 + $0xe] sm:$0x3] %vm121_vm0, %v120_v44 }
  0x15   :  { %161 = shalt.err (!%p158_p4)
}
  0x16   :  { %s162_s5 = scalar_lea.hbm %s248_s3, 256 }
  0x17   :  { %p163_p5 = scmp.ne.s32.totalorder %s248_s3, %s162_s5  ;;  %p166_p6 = scmp.lt.u32.totalorder %s162_s5, %s248_s3 }
  0x19   :  { %p168_p7 = pnand %p166_p6, %p163_p5 }
  0x1b   :  { %171 = shalt.err (!%p168_p7)
}
  0x1c   :  { %s176_s10 = smov 32   ;;  %s177_s11 = smov 2  }
  0x1d   :  { %141 = dma.vmem_to_hbm [thread:$0]  %s136_s29, 256, %s248_s3, [#allocation5], %s176_s10, %s176_s10, %s177_s11  }
  0x1e   :  { %172 = dma.done.wait [#allocation5], 256  }
  0x1f   :  { %173 = vsyncadd [#allocation5], 4294967040 }
  0x20   :  { %145 = vsyncpa [#allocation5], 1 }

</bundles_post_ra>
